<compile_context>
chip_gen: v5e
topology: v5e:2x2
jax: 0.10.0
libtpu: 0.0.40
codegen_flags: <defaults>
</compile_context>

<pallas_src>
import functools

import jax
import jax.numpy as jnp
import numpy as np
from jax import lax
from jax.experimental import pallas as pl
from jax.experimental.pallas import tpu as pltpu


def _round_up(x, m):
    return -(-x // m) * m


# ---------------------------------------------------------------------------
# Kernel: one grid step = one (batch-tile, feature-tile).  Accumulates the
# tile's weighted contribution into this batch tile's scalar SMEM output.
# ---------------------------------------------------------------------------
def _seq2seq_loss_kernel(pred_ref, tgt_ref, out_ref, carry_ref, *,
                         mse_scale, l1_scale, smooth_scale, C, L, tl, nl):
    lj = pl.program_id(1)                              # feature-tile index (inner)

    p = pred_ref[...].astype(jnp.float32)              # [bb, tl] in-register upcast
    t = tgt_ref[...].astype(jnp.float32)
    d = p - t

    # --- fuse all active terms into one elementwise value ------------------
    val = jnp.zeros_like(d)
    if mse_scale > 0.0:                                # static branches: zero-weight
        val = val + mse_scale * (d * d)                # terms are compiled out
    if l1_scale > 0.0:
        val = val + l1_scale * jnp.abs(d)

    smooth_extra = None
    if smooth_scale > 0.0:
        # Flattened smoothness: dd[l] = d[l] - d[l - C] for C <= l < L.
        if tl % 128 == 0:
            # Lane-aligned tile: XLU roll + iota mask (no slice copies).
            local = lax.broadcasted_iota(jnp.int32, d.shape, 1)
            dd = d - pltpu.roll(d, shift=C, axis=1)    # roll wraps first C columns
            keep = local >= C                          # drop wrapped / first-row cols
            if nl * tl > L:                            # drop zero-padded tail cols
                keep = keep & ((local + lj * tl) < L)
            val = val + jnp.where(keep, smooth_scale * (dd * dd), 0.0)
        else:
            # Small single unaligned tile (nl == 1, no padding): plain shift diff.
            sm = d[:, C:] - d[:, :-C]
            smooth_extra = smooth_scale * jnp.sum(sm * sm)

    have_val = (mse_scale > 0.0) or (l1_scale > 0.0) or \
               (smooth_scale > 0.0 and tl % 128 == 0)
    partial = jnp.sum(val) if have_val else jnp.float32(0.0)
    if smooth_extra is not None:
        partial = partial + smooth_extra

    @pl.when(lj == 0)
    def _init():
        out_ref[0, 0] = partial

    @pl.when(lj > 0)
    def _accum():
        extra = jnp.float32(0.0)
        if smooth_scale > 0.0 and nl > 1:
            # Feature-tile boundary: the first C columns of this tile pair with
            # the carried last C columns of the previous feature tile.
            dd_h = d[:, :C] - carry_ref[...]
            col_h = lax.broadcasted_iota(jnp.int32, (d.shape[0], C), 1) + lj * tl
            extra = jnp.sum(jnp.where(col_h < L,
                                      smooth_scale * (dd_h * dd_h), 0.0))
        out_ref[0, 0] += partial + extra

    if smooth_scale > 0.0 and nl > 1:
        carry_ref[...] = d[:, tl - C:]                 # tail of d for the next tile


# ---------------------------------------------------------------------------
# Wrapper
# ---------------------------------------------------------------------------
def seq2seq_loss(predictions, targets, *, mse_weight=1.0, l1_weight=0.0,
                 smoothness_weight=0.0, block_elems=512 * 1024):
    """Forward pass of Seq2SeqLoss; returns a float32 scalar."""
    B, T, C = predictions.shape
    assert targets.shape == (B, T, C)
    if targets.dtype != predictions.dtype:
        targets = targets.astype(predictions.dtype)

    if not (mse_weight > 0 or l1_weight > 0 or smoothness_weight > 0):
        return jnp.float32(0.0)

    itemsize = predictions.dtype.itemsize
    sub = max(8, 8 * (4 // max(itemsize, 1)))          # f32: 8, bf16: 16, int8: 32
    L = T * C                                          # lane-dense flattened axis

    # --- tile selection (sized against a per-generation-safe VMEM budget) ---
    tl_cap = max(128, (block_elems // sub) // 128 * 128)
    if L <= tl_cap:
        tl, nl, L_pad = L, 1, L                        # whole feature row in one tile
    else:
        tl = max(tl_cap, _round_up(C, 128))            # boundary carry needs tl >= C
        L_pad = _round_up(L, tl)
        nl = L_pad // tl
    bb_cap = max(sub, (block_elems // tl) // sub * sub)
    bb = min(bb_cap, _round_up(B, sub))
    nb = -(-B // bb)
    B_pad = nb * bb

    # Flatten to lane-dense [B, L] (free) and zero-pad to the tile grid; zero
    # pads contribute exactly 0 to every term.
    p2 = predictions.reshape(B, L)
    t2 = targets.reshape(B, L)
    if B_pad != B or L_pad != L:
        pads = ((0, B_pad - B), (0, L_pad - L))
        p2 = jnp.pad(p2, pads)
        t2 = jnp.pad(t2, pads)

    # Fold the static weights and 1/N normalizers into per-term scales.
    n = B * T * C
    n_smooth = B * (T - 1) * C
    mse_scale = float(mse_weight) / n if mse_weight > 0 else 0.0
    l1_scale = float(l1_weight) / n if l1_weight > 0 else 0.0
    smooth_scale = (float(smoothness_weight) / n_smooth
                    if (smoothness_weight > 0 and n_smooth > 0) else 0.0)

    kernel = functools.partial(
        _seq2seq_loss_kernel,
        mse_scale=mse_scale, l1_scale=l1_scale, smooth_scale=smooth_scale,
        C=C, L=L, tl=tl, nl=nl)

    buf_bytes = 2 * 2 * bb * tl * itemsize             # 2 inputs x double buffer
    vmem_limit = int(min(48 * 1024 * 1024,
                         max(32 * 1024 * 1024, 2 * buf_bytes)))

    partials = pl.pallas_call(
        kernel,
        out_shape=jax.ShapeDtypeStruct((nb, 1), jnp.float32),
        grid_spec=pltpu.PrefetchScalarGridSpec(
            num_scalar_prefetch=0,
            grid=(nb, nl),
            in_specs=[
                pl.BlockSpec((bb, tl), lambda i, j: (i, j)),
                pl.BlockSpec((bb, tl), lambda i, j: (i, j)),
            ],
            out_specs=pl.BlockSpec((1, 1), lambda i, j: (i, 0),
                                   memory_space=pltpu.MemorySpace.SMEM),
            scratch_shapes=[pltpu.VMEM((bb, C), jnp.float32)],   # boundary carry
        ),
        compiler_params=pltpu.CompilerParams(
            dimension_semantics=("parallel", "arbitrary"),
            vmem_limit_bytes=vmem_limit),
    )(p2, t2)

    total = jnp.sum(partials)                          # tiny (nb,) reduction outside

    if smoothness_weight > 0 and T < 2:
        # Match PyTorch: MSELoss over an empty temporal diff is NaN.
        total = total + jnp.float32(jnp.nan)
    return total


# ---------------------------------------------------------------------------
# Pure-JAX reference mirroring the PyTorch module.
# ---------------------------------------------------------------------------
def reference_loss(pred, tgt, mse_weight=1.0, l1_weight=0.0,
                   smoothness_weight=0.0):
    pred = pred.astype(jnp.float32)
    tgt = tgt.astype(jnp.float32)
    total = jnp.float32(0.0)
    if mse_weight > 0:
        total += mse_weight * jnp.mean((pred - tgt) ** 2)
    if l1_weight > 0:
        total += l1_weight * jnp.mean(jnp.abs(pred - tgt))
    if smoothness_weight > 0:
        pd = pred[:, 1:, :] - pred[:, :-1, :]
        td = tgt[:, 1:, :] - tgt[:, :-1, :]
        total += smoothness_weight * jnp.mean((pd - td) ** 2)
    return total


# ---------------------------------------------------------------------------
if __name__ == "__main__":
    key = jax.random.PRNGKey(0)
    kp, kt = jax.random.split(key)

    def check(pred, tgt, tol=1e-5, **cfg):
        out = jax.block_until_ready(seq2seq_loss(pred, tgt, **cfg))
        kw = {k: v for k, v in cfg.items() if k != "block_elems"}
        ref = reference_loss(pred, tgt, **kw)
        np.testing.assert_allclose(np.asarray(out), np.asarray(ref),
                                   rtol=tol, atol=tol)

    # Small shape consistent with the module: [batch, seq_len, control_dim].
    B, T, C = 2, 8, 4
    pred = jax.random.normal(kp, (B, T, C), jnp.float32)
    tgt = jax.random.normal(kt, (B, T, C), jnp.float32)

    # 1) module defaults (MSE only)
    check(pred, tgt, mse_weight=1.0, l1_weight=0.0, smoothness_weight=0.0)
    # 2) all three terms (unaligned single-tile path)
    check(pred, tgt, mse_weight=1.0, l1_weight=0.5, smoothness_weight=0.25)
    # 3) bf16 inputs streamed natively (no wrapper upcast), f32 in-kernel math
    check(pred.astype(jnp.bfloat16), tgt.astype(jnp.bfloat16),
          mse_weight=1.0, l1_weight=0.5, smoothness_weight=0.25)
    # 4) lane-aligned single tile (roll + mask path, nl == 1)
    pred4 = jax.random.normal(kp, (4, 16, 8), jnp.float32)
    tgt4 = jax.random.normal(kt, (4, 16, 8), jnp.float32)
    check(pred4, tgt4, mse_weight=1.0, l1_weight=0.3, smoothness_weight=0.2)
    # 5) multi-tile grid: feature tiling + boundary carry + batch/lane padding
    #    + "parallel" batch axis, forced at a small shape via block_elems.
    pred5 = jax.random.normal(kp, (10, 60, 16), jnp.float32)
    tgt5 = jax.random.normal(kt, (10, 60, 16), jnp.float32)
    check(pred5, tgt5, mse_weight=1.0, l1_weight=0.3, smoothness_weight=0.2,
          block_elems=2048)

    print("KERNEL_OK")
</pallas_src>

<mosaic_0001>
module attributes {stable_mosaic.version = 11 : i64} {
  func.func @_seq2seq_loss_kernel(%arg0: i32, %arg1: i32, %arg2: memref<8x32xf32, #tpu.memory_space<vmem>>, %arg3: memref<8x32xf32, #tpu.memory_space<vmem>>, %arg4: memref<1x1xf32, #tpu.memory_space<smem>>, %arg5: memref<8x4xf32, #tpu.memory_space<vmem>>) attributes {dimension_semantics = [#tpu.dimension_semantics<parallel>, #tpu.dimension_semantics<arbitrary>], iteration_bounds = array<i64: 1, 1>, scalar_prefetch = 0 : i64, scratch_operands = 1 : i64, tpu.core_type = #tpu.core_type<tc>, window_params = [{transform_indices = @transform_0, window_bounds = array<i64: 8, 32>}, {transform_indices = @transform_1, window_bounds = array<i64: 8, 32>}, {transform_indices = @transform_2, window_bounds = array<i64: 1, 1>}]} {
    %c0 = arith.constant 0 : index
    %c0_0 = arith.constant 0 : index
    %0 = vector.load %arg2[%c0, %c0_0] : memref<8x32xf32, #tpu.memory_space<vmem>>, vector<8x32xf32>
    %c0_1 = arith.constant 0 : index
    %c0_2 = arith.constant 0 : index
    %1 = vector.load %arg3[%c0_1, %c0_2] : memref<8x32xf32, #tpu.memory_space<vmem>>, vector<8x32xf32>
    %2 = arith.subf %0, %1 : vector<8x32xf32>
    %cst = arith.constant 0.000000e+00 : f32
    %3 = vector.broadcast %cst : f32 to vector<8x32xf32>
    %4 = arith.mulf %2, %2 : vector<8x32xf32>
    %cst_3 = arith.constant 1.562500e-02 : f32
    %5 = vector.broadcast %cst_3 : f32 to vector<8x32xf32>
    %6 = arith.mulf %5, %4 : vector<8x32xf32>
    %7 = arith.addf %3, %6 : vector<8x32xf32>
    %8 = vector.shape_cast %7 : vector<8x32xf32> to vector<1x8x32xf32>
    %cst_4 = arith.constant dense<0.000000e+00> : vector<1xf32>
    %9 = vector.multi_reduction <add>, %8, %cst_4 [1, 2] : vector<1x8x32xf32> to vector<1xf32>
    %10 = vector.shape_cast %9 : vector<1xf32> to vector<1x1x1xf32>
    %11 = vector.extract %10[0, 0, 0] : f32 from vector<1x1x1xf32>
    %c0_i32 = arith.constant 0 : i32
    %12 = arith.cmpi eq, %arg1, %c0_i32 : i32
    %13 = arith.extui %12 : i1 to i32
    %c0_i32_5 = arith.constant 0 : i32
    %14 = arith.cmpi ne, %13, %c0_i32_5 : i32
    scf.if %14 {
      %c0_8 = arith.constant 0 : index
      %c0_9 = arith.constant 0 : index
      %18 = memref.load %arg4[%c0_8, %c0_9] : memref<1x1xf32, #tpu.memory_space<smem>>
      memref.store %11, %arg4[%c0_8, %c0_9] : memref<1x1xf32, #tpu.memory_space<smem>>
    } else {
    }
    %c0_i32_6 = arith.constant 0 : i32
    %15 = arith.cmpi sgt, %arg1, %c0_i32_6 : i32
    %16 = arith.extui %15 : i1 to i32
    %c0_i32_7 = arith.constant 0 : i32
    %17 = arith.cmpi ne, %16, %c0_i32_7 : i32
    scf.if %17 {
      %c0_8 = arith.constant 0 : index
      %c0_9 = arith.constant 0 : index
      %18 = memref.load %arg4[%c0_8, %c0_9] : memref<1x1xf32, #tpu.memory_space<smem>>
      %cst_10 = arith.constant 0.000000e+00 : f32
      %19 = arith.addf %11, %cst_10 : f32
      %20 = arith.addf %18, %19 : f32
      %c0_11 = arith.constant 0 : index
      %c0_12 = arith.constant 0 : index
      %21 = memref.load %arg4[%c0_11, %c0_12] : memref<1x1xf32, #tpu.memory_space<smem>>
      memref.store %20, %arg4[%c0_11, %c0_12] : memref<1x1xf32, #tpu.memory_space<smem>>
    } else {
    }
    return
  }
  func.func @transform_0(%arg0: i32, %arg1: i32) -> (i32, i32) {
    %c0_i32 = arith.constant 0 : i32
    return %arg0, %arg1 : i32, i32
  }
  func.func @transform_1(%arg0: i32, %arg1: i32) -> (i32, i32) {
    %c0_i32 = arith.constant 0 : i32
    return %arg0, %arg1 : i32, i32
  }
  func.func @transform_2(%arg0: i32, %arg1: i32) -> (i32, i32) {
    %c0_i32 = arith.constant 0 : i32
    %c0_i32_0 = arith.constant 0 : i32
    return %arg0, %c0_i32 : i32, i32
  }
}

</mosaic_0001>

<bundles_post_ra>
// kernel: tpu_custom_call.1
= control target key start
LH: loop header
LB: loop body
LE: loop exit
PB: predicated region body
PF: predicated region fallthrough
CT: control target
= control target key end

     0   :  { %7 = vsyncpa [#allocation4], 0  ;;  %s187_s0 = inlined_call_operand.hbm [shape: f32[8,32], index: 0, kind: input, shape index: {}]   ;;  %s188_s1 = inlined_call_operand.hbm [shape: f32[8,32], index: 1, kind: input, shape index: {}]   ;;  %s189_s2 = inlined_call_operand.hbm [shape: f32[1,1], index: 2, kind: output, shape index: {}]  }
   0x1   :  { %8 = vsyncpa [#allocation7], 0 }
   0x2   :  { %9 = vsyncpa [#allocation5], 0  ;;  %s15_s11 = sshll.u32 %s187_s0, 4  ;;  %s160_s12 = smov [#allocation3]   ;;  %s16_s11 = int_to_ptr.hbm [resolvable:$true] %s15_s11 }
   0x3   :  { %s17_s13 = sshll.u32 %s160_s12, 4  ;;  %s26_s16 = sshll.u32 %s188_s1, 4  ;;  %s18_s13 = int_to_ptr.vmem [resolvable:$true] %s17_s13  ;;  %s27_s16 = int_to_ptr.hbm [resolvable:$true] %s26_s16 }
   0x4   :  { %20 = dma.hbm_to_vmem [thread:$0]  %s16_s11, 128, %s18_s13, [#allocation4]  }
   0x5   :  { %s161_s17 = smov [#allocation6]  }
   0x6   :  { %s28_s18 = sshll.u32 %s161_s17, 4  ;;  %s29_s18 = int_to_ptr.vmem [resolvable:$true] %s28_s18 }
   0x7   :  { %31 = dma.hbm_to_vmem [thread:$0]  %s27_s16, 128, %s29_s18, [#allocation7]  }
   0x8   :  { %154 = dma.done.wait [#allocation4], 128  }
   0x9   :  { %155 = vsyncadd [#allocation4], 4294967168 }
   0xa   :  { %156 = dma.done.wait [#allocation7], 128  }
   0xb   :  { %157 = vsyncadd [#allocation7], 4294967168  ;;  %v40_v0 = vld [vmem:[#allocation3] sm:$0xff]  ;;  %v41_v1 = vld [vmem:[#allocation6] sm:$0xff]  ;;  %vm46_vm0 = vcmask 261120   ;;  %s77_s19 = sshll.u32 %s189_s2, 4  ;;  %s78_s19 = int_to_ptr.hbm [resolvable:$true] %s77_s19 }
   0xc   :  { %v42_v2 = vsub.f32 %v40_v0, %v41_v1  ;;  %s162_s21 = smov [#allocation8]  }
   0xe   :  { %v43_v3 = vmul.f32 %v42_v2, %v42_v2 }
  0x10   :  { %v44_v4 = vmul.f32 0.015625, %v43_v3 }
  0x12   :  { %v47_v5 = vsel %vm46_vm0, %v44_v4, 0.0 }
  0x13   :  { %48 = vadd.xlane.f32.xlu0 %v47_v5 }
  0x86   :  { %v49_v6 = vpop.xlane.xlu0 %48 }
  0x87   :  { %v50_v7 = vrot.slane %v49_v6, 4 }
  0x89   :  { %v51_v8 = vadd.f32 %v50_v7, %v49_v6 }
  0x8b   :  { %v52_v9 = vrot.slane %v51_v8, 2 }
  0x8d   :  { %v53_v10 = vadd.f32 %v52_v9, %v51_v8 }
  0x8f   :  { %v54_v11 = vrot.slane %v53_v10, 1 }
  0x91   :  { %v55_v12 = vadd.f32 %v54_v11, %v53_v10 }
  0x93   :  { %89 = vpush %v55_v12 }
  0xc4   :  { %s90_s20 = spop %89 }
  0xc5   :  { %62 = sst [smem:[#allocation8]] %s90_s20 }
  0xc6   :  { %80 = dma.smem_to_hbm %s162_s21, 16, %s78_s19, [#allocation5]  }
  0xc7   :  { %158 = dma.done.wait [#allocation5], 16  }
  0xc8   :  { %159 = vsyncadd [#allocation5], 4294967280 }
  0xc9   :  { %85 = sfence }
  0xca   :  { %86 = vsyncpa [#allocation4], 1 }
  0xcb   :  { %87 = vsyncpa [#allocation7], 1 }
  0xcc   :  { %88 = vsyncpa [#allocation5], 1 }

</bundles_post_ra>
